<compile_context>
chip_gen: v5e
topology: v5e:2x2
jax: 0.10.0
libtpu: 0.0.40
codegen_flags: <defaults>
</compile_context>

<pallas_src>
import jax
import jax.numpy as jnp
from jax.experimental import pallas as pl
from jax.experimental.pallas import tpu as pltpu


# ----------------------------------------------------------------------------
# Hardware-aware sizing helpers
# ----------------------------------------------------------------------------
def _vmem_budget_and_limit():
    """Return (working-set budget bytes, scoped vmem_limit_bytes).

    v5e/v6e (128 MiB physical) -> limit 96 MiB, working-set budget 48 MiB.
    v7x (64 MiB per TensorCore) -> limit 48 MiB, working-set budget 40 MiB.
    """
    try:
        cap = int(pltpu.get_tpu_info().vmem_capacity_bytes)
    except Exception:
        cap = 64 * 1024 * 1024  # conservative (v7x per-TC) fallback
    limit = int(min(cap - 16 * 1024 * 1024, 96 * 1024 * 1024))
    budget = int(min(limit - 8 * 1024 * 1024, 48 * 1024 * 1024))
    return budget, limit


def _mxu_crossover():
    """Cin*Cout above which the contraction should run on the MXU."""
    try:
        kind = jax.devices()[0].device_kind.lower()
    except Exception:
        kind = ""
    if "v5" in kind:
        return 512
    if "v7" in kind or "7x" in kind:
        return 128
    return 256  # v6e default


# ----------------------------------------------------------------------------
# Kernels
# ----------------------------------------------------------------------------
def _conv1x1_relu_vpu_kernel(x_ref, w_ref, b_ref, act_ref, relu_ref):
    """Small-channel path: scalar-weight FMA chain on dense (TS, 128) planes.

    x_ref   : (Cin, TS, 128)  VMEM  input pixel planes (lane-dense)
    w_ref   : (Cout, Cin)     SMEM  conv weight (scalar splat operands)
    b_ref   : (Cout,)         SMEM  conv bias
    act_ref : (Cout, TS, 128) VMEM  conv output  -> captured activation
    relu_ref: (Cout, TS, 128) VMEM  model output -> ReLU(conv)
    """
    x = x_ref[...]                         # (Cin, TS, 128)
    cin = x.shape[0]
    cout = act_ref.shape[0]
    for co in range(cout):
        acc = x[0] * w_ref[co, 0]          # scalar * vector splat (VPU)
        for ci in range(1, cin):
            acc = acc + x[ci] * w_ref[co, ci]
        y = acc + b_ref[co]
        act_ref[co] = y.astype(act_ref.dtype)
        relu_ref[co] = jnp.maximum(y, 0.0).astype(relu_ref.dtype)


def _conv1x1_relu_mxu_kernel(x_ref, w_ref, b_ref, act_ref, relu_ref):
    """Large-channel path: MXU contraction, f32 accumulation.

    x_ref   : (Cin, TP)   VMEM   w_ref: (Cout, Cin) VMEM   b_ref: (Cout, 1) VMEM
    act_ref / relu_ref : (Cout, TP) VMEM
    """
    y = jnp.dot(w_ref[...], x_ref[...], preferred_element_type=jnp.float32)
    y = y + b_ref[...]
    act_ref[...] = y.astype(act_ref.dtype)
    relu_ref[...] = jnp.maximum(y, 0.0).astype(relu_ref.dtype)


# ----------------------------------------------------------------------------
# Wrapper: fused 1x1 conv (+bias) and ReLU (NCHW in, NCHW out)
# ----------------------------------------------------------------------------
def conv1x1_relu_pallas(x_nchw, weight, bias):
    """x: (N,Cin,H,W) f32, weight: (Cout,Cin) [or (Cout,Cin,1,1)], bias: (Cout,).

    Returns (conv_out, relu_out), both (N, Cout, H, W) float32.
    """
    x_nchw = jnp.asarray(x_nchw, jnp.float32)
    weight = jnp.asarray(weight, jnp.float32)
    if weight.ndim == 4:                      # PyTorch Conv2d 1x1 weight layout
        weight = weight.reshape(weight.shape[0], weight.shape[1])
    bias = jnp.asarray(bias, jnp.float32)

    N, Cin, H, W = x_nchw.shape
    Cout = weight.shape[0]
    HW = H * W
    HWp = ((HW + 127) // 128) * 128           # lane-aligned pixel extent

    x3 = x_nchw.reshape(N, Cin, HW)           # free reshape; pixels on lanes
    if HWp != HW:
        x3 = jnp.pad(x3, ((0, 0), (0, 0), (0, HWp - HW)))

    budget, vmem_limit = _vmem_budget_and_limit()
    use_mxu = (Cin * Cout) >= _mxu_crossover()

    cost = pl.CostEstimate(
        flops=2 * N * HW * Cin * Cout,
        transcendentals=0,
        bytes_accessed=4 * (N * HWp * Cin + 2 * N * HWp * Cout + Cout * Cin + Cout),
    )
    compiler_params = pltpu.CompilerParams(
        dimension_semantics=("parallel", "parallel"),
        vmem_limit_bytes=vmem_limit,
    )

    if use_mxu:
        # ----- MXU path --------------------------------------------------
        # TODO(synk): pad Cin/Cout to the per-generation MXU dim (128 on v5e,
        # 256 on v6e/v7x) once compute-bound; kept unpadded (mem-bound) here.
        per_col = (Cin + 2 * Cout) * 4
        tp = max(128, (budget // (2 * per_col)) // 128 * 128)
        if N == 1:
            half = max(128, ((-(-HWp // 2)) + 127) // 128 * 128)
            if half < HWp:
                tp = min(tp, half)            # keep >= 2 blocks for v7x megacore
        tp = min(tp, HWp)
        grid = (N, pl.cdiv(HWp, tp))
        b2 = bias.reshape(Cout, 1)

        act3, relu3 = pl.pallas_call(
            _conv1x1_relu_mxu_kernel,
            out_shape=(
                jax.ShapeDtypeStruct((N, Cout, HWp), jnp.float32),
                jax.ShapeDtypeStruct((N, Cout, HWp), jnp.float32),
            ),
            grid=grid,
            in_specs=[
                pl.BlockSpec((None, Cin, tp), lambda n, p: (n, 0, p)),
                pl.BlockSpec((Cout, Cin), lambda n, p: (0, 0)),   # resident
                pl.BlockSpec((Cout, 1), lambda n, p: (0, 0)),     # resident
            ],
            out_specs=(
                pl.BlockSpec((None, Cout, tp), lambda n, p: (n, 0, p)),
                pl.BlockSpec((None, Cout, tp), lambda n, p: (n, 0, p)),
            ),
            compiler_params=compiler_params,
            cost_estimate=cost,
        )(x3, weight, b2)
    else:
        # ----- VPU path (small channel counts) ----------------------------
        R = HWp // 128
        x4 = x3.reshape(N, Cin, R, 128)        # dense (sublane, lane) planes
        per_row = (Cin + 2 * Cout) * 128 * 4   # bytes moved per TS row
        ts = max(8, (budget // (2 * per_row)) // 8 * 8)
        if N == 1 and R > 8:
            half = max(8, ((-(-R // 2)) + 7) // 8 * 8)
            if half < R:
                ts = min(ts, half)             # keep >= 2 blocks for v7x megacore
        ts = min(ts, R)                        # full extent is always legal
        grid = (N, pl.cdiv(R, ts))

        act4, relu4 = pl.pallas_call(
            _conv1x1_relu_vpu_kernel,
            out_shape=(
                jax.ShapeDtypeStruct((N, Cout, R, 128), jnp.float32),
                jax.ShapeDtypeStruct((N, Cout, R, 128), jnp.float32),
            ),
            grid=grid,
            in_specs=[
                pl.BlockSpec((None, Cin, ts, 128), lambda n, p: (n, 0, p, 0)),
                pl.BlockSpec(memory_space=pltpu.MemorySpace.SMEM),  # weight
                pl.BlockSpec(memory_space=pltpu.MemorySpace.SMEM),  # bias
            ],
            out_specs=(
                pl.BlockSpec((None, Cout, ts, 128), lambda n, p: (n, 0, p, 0)),
                pl.BlockSpec((None, Cout, ts, 128), lambda n, p: (n, 0, p, 0)),
            ),
            compiler_params=compiler_params,
            cost_estimate=cost,
        )(x4, weight, bias)
        act3 = act4.reshape(N, Cout, HWp)
        relu3 = relu4.reshape(N, Cout, HWp)

    if HWp != HW:
        act3 = act3[:, :, :HW]
        relu3 = relu3[:, :, :HW]
    return act3.reshape(N, Cout, H, W), relu3.reshape(N, Cout, H, W)


# ----------------------------------------------------------------------------
# Minimal hook machinery mimicking torch.nn forward hooks (Python-level glue).
# ----------------------------------------------------------------------------
class Conv1x1Layer:
    """Stand-in for nn.Conv2d(Cin, Cout, 1) whose compute runs in Pallas."""

    def __init__(self, weight, bias):
        self.weight = weight      # (Cout, Cin)
        self.bias = bias          # (Cout,)
        self._forward_hooks = []
        self._last_relu = None

    def register_forward_hook(self, hook):
        self._forward_hooks.append(hook)

    def __call__(self, x_nchw):
        conv_out, relu_out = conv1x1_relu_pallas(x_nchw, self.weight, self.bias)
        for hook in self._forward_hooks:
            hook(self, (x_nchw,), conv_out)
        # The layer itself is just the conv; ReLU belongs to the "model" but is
        # fused in the same kernel to avoid a second HBM pass.
        self._last_relu = relu_out
        return conv_out


class ActivationSampler:
    """JAX/Pallas port of cnnexplorer.utils.ActivationSampler."""

    def __init__(self, model):
        self.model_name = model.__class__.__name__
        self.activation = None
        model.register_forward_hook(self.get_hook())

    def forward(self, x=None):
        return self.activation

    def __call__(self, x=None):
        return self.forward(x)

    def get_hook(self):
        def hook(model, input, output):
            self.activation = output
        return hook

    def extra_repr(self):
        return f'{self.model_name}'


class TinyModel:
    """Sequential(Conv2d(Cin,Cout,1), ReLU) — ReLU fused into the Pallas kernel."""

    def __init__(self, conv):
        self.conv = conv

    def __call__(self, x_nchw):
        _ = self.conv(x_nchw)          # conv output captured by the hook
        return self.conv._last_relu    # model output = ReLU(conv)


if __name__ == "__main__":
    key = jax.random.PRNGKey(0)
    kx, kw, kb = jax.random.split(key, 3)

    N, Cin, Cout, H, W = 2, 4, 4, 16, 16
    x = jax.random.normal(kx, (N, Cin, H, W), dtype=jnp.float32)
    weight = jax.random.normal(kw, (Cout, Cin), dtype=jnp.float32) * 0.1
    bias = jax.random.normal(kb, (Cout,), dtype=jnp.float32) * 0.1

    conv_layer = Conv1x1Layer(weight, bias)
    sampler = ActivationSampler(conv_layer)
    model = TinyModel(conv_layer)

    model_out = model(x)                 # ReLU(conv(x))
    activation = sampler()               # conv(x), captured by the hook
    jax.block_until_ready(activation)
    jax.block_until_ready(model_out)

    # Reference check (plain JAX) for the captured activation and model output.
    ref = jnp.einsum("nchw,oc->nohw", x, weight) + bias[None, :, None, None]
    assert jnp.allclose(activation, ref, atol=1e-4), "activation mismatch"
    assert jnp.allclose(model_out, jnp.maximum(ref, 0.0), atol=1e-4), "relu mismatch"

    print("KERNEL_OK")
</pallas_src>

<mosaic_0001>
module attributes {stable_mosaic.version = 11 : i64} {
  func.func @_conv1x1_relu_vpu_kernel(%arg0: i32, %arg1: i32, %arg2: memref<1x4x2x128xf32, #tpu.memory_space<vmem>>, %arg3: memref<4x4xf32, #tpu.memory_space<smem>>, %arg4: memref<4xf32, #tpu.memory_space<smem>>, %arg5: memref<1x4x2x128xf32, #tpu.memory_space<vmem>>, %arg6: memref<1x4x2x128xf32, #tpu.memory_space<vmem>>) attributes {dimension_semantics = [#tpu.dimension_semantics<parallel>, #tpu.dimension_semantics<parallel>], iteration_bounds = array<i64: 2, 1>, scalar_prefetch = 0 : i64, scratch_operands = 0 : i64, tpu.core_type = #tpu.core_type<tc>, window_params = [{transform_indices = @transform_0, window_bounds = array<i64: 1, 4, 2, 128>}, {transform_indices = @transform_1, window_bounds = array<i64: 4, 4>}, {transform_indices = @transform_2, window_bounds = array<i64: 4>}, {transform_indices = @transform_3, window_bounds = array<i64: 1, 4, 2, 128>}, {transform_indices = @transform_4, window_bounds = array<i64: 1, 4, 2, 128>}]} {
    %c0 = arith.constant 0 : index
    %c0_0 = arith.constant 0 : index
    %c0_1 = arith.constant 0 : index
    %c0_2 = arith.constant 0 : index
    %0 = vector.load %arg2[%c0, %c0_0, %c0_1, %c0_2] : memref<1x4x2x128xf32, #tpu.memory_space<vmem>>, vector<1x4x2x128xf32>
    %1 = vector.shape_cast %0 : vector<1x4x2x128xf32> to vector<4x2x128xf32>
    %2 = vector.extract_strided_slice %1 {offsets = [0, 0, 0], sizes = [1, 2, 128], strides = [1, 1, 1]} : vector<4x2x128xf32> to vector<1x2x128xf32>
    %3 = vector.shape_cast %2 : vector<1x2x128xf32> to vector<2x128xf32>
    %c0_3 = arith.constant 0 : index
    %c0_4 = arith.constant 0 : index
    %4 = memref.load %arg3[%c0_3, %c0_4] : memref<4x4xf32, #tpu.memory_space<smem>>
    %5 = vector.broadcast %4 : f32 to vector<2x128xf32>
    %6 = arith.mulf %3, %5 : vector<2x128xf32>
    %7 = vector.extract_strided_slice %1 {offsets = [1, 0, 0], sizes = [1, 2, 128], strides = [1, 1, 1]} : vector<4x2x128xf32> to vector<1x2x128xf32>
    %8 = vector.shape_cast %7 : vector<1x2x128xf32> to vector<2x128xf32>
    %c0_5 = arith.constant 0 : index
    %c1 = arith.constant 1 : index
    %9 = memref.load %arg3[%c0_5, %c1] : memref<4x4xf32, #tpu.memory_space<smem>>
    %10 = vector.broadcast %9 : f32 to vector<2x128xf32>
    %11 = arith.mulf %8, %10 : vector<2x128xf32>
    %12 = arith.addf %6, %11 : vector<2x128xf32>
    %13 = vector.extract_strided_slice %1 {offsets = [2, 0, 0], sizes = [1, 2, 128], strides = [1, 1, 1]} : vector<4x2x128xf32> to vector<1x2x128xf32>
    %14 = vector.shape_cast %13 : vector<1x2x128xf32> to vector<2x128xf32>
    %c0_6 = arith.constant 0 : index
    %c2 = arith.constant 2 : index
    %15 = memref.load %arg3[%c0_6, %c2] : memref<4x4xf32, #tpu.memory_space<smem>>
    %16 = vector.broadcast %15 : f32 to vector<2x128xf32>
    %17 = arith.mulf %14, %16 : vector<2x128xf32>
    %18 = arith.addf %12, %17 : vector<2x128xf32>
    %19 = vector.extract_strided_slice %1 {offsets = [3, 0, 0], sizes = [1, 2, 128], strides = [1, 1, 1]} : vector<4x2x128xf32> to vector<1x2x128xf32>
    %20 = vector.shape_cast %19 : vector<1x2x128xf32> to vector<2x128xf32>
    %c0_7 = arith.constant 0 : index
    %c3 = arith.constant 3 : index
    %21 = memref.load %arg3[%c0_7, %c3] : memref<4x4xf32, #tpu.memory_space<smem>>
    %22 = vector.broadcast %21 : f32 to vector<2x128xf32>
    %23 = arith.mulf %20, %22 : vector<2x128xf32>
    %24 = arith.addf %18, %23 : vector<2x128xf32>
    %c0_8 = arith.constant 0 : index
    %25 = memref.load %arg4[%c0_8] : memref<4xf32, #tpu.memory_space<smem>>
    %26 = vector.broadcast %25 : f32 to vector<2x128xf32>
    %27 = arith.addf %24, %26 : vector<2x128xf32>
    %c0_9 = arith.constant 0 : index
    %c0_10 = arith.constant 0 : index
    %c0_11 = arith.constant 0 : index
    %c0_12 = arith.constant 0 : index
    %28 = vector.load %arg5[%c0_9, %c0_10, %c0_11, %c0_12] : memref<1x4x2x128xf32, #tpu.memory_space<vmem>>, vector<1x1x2x128xf32>
    %29 = vector.shape_cast %28 : vector<1x1x2x128xf32> to vector<2x128xf32>
    %30 = vector.shape_cast %27 : vector<2x128xf32> to vector<1x1x2x128xf32>
    tpu.vector_store %arg5[%c0_9, %c0_10, %c0_11, %c0_12], %30 {strides = array<i32>} : memref<1x4x2x128xf32, #tpu.memory_space<vmem>>, vector<1x1x2x128xf32>,
    %cst = arith.constant 0.000000e+00 : f32
    %31 = vector.broadcast %cst : f32 to vector<2x128xf32>
    %32 = arith.maximumf %27, %31 : vector<2x128xf32>
    %c0_13 = arith.constant 0 : index
    %c0_14 = arith.constant 0 : index
    %c0_15 = arith.constant 0 : index
    %c0_16 = arith.constant 0 : index
    %33 = vector.load %arg6[%c0_13, %c0_14, %c0_15, %c0_16] : memref<1x4x2x128xf32, #tpu.memory_space<vmem>>, vector<1x1x2x128xf32>
    %34 = vector.shape_cast %33 : vector<1x1x2x128xf32> to vector<2x128xf32>
    %35 = vector.shape_cast %32 : vector<2x128xf32> to vector<1x1x2x128xf32>
    tpu.vector_store %arg6[%c0_13, %c0_14, %c0_15, %c0_16], %35 {strides = array<i32>} : memref<1x4x2x128xf32, #tpu.memory_space<vmem>>, vector<1x1x2x128xf32>,
    %36 = vector.extract_strided_slice %1 {offsets = [0, 0, 0], sizes = [1, 2, 128], strides = [1, 1, 1]} : vector<4x2x128xf32> to vector<1x2x128xf32>
    %37 = vector.shape_cast %36 : vector<1x2x128xf32> to vector<2x128xf32>
    %c1_17 = arith.constant 1 : index
    %c0_18 = arith.constant 0 : index
    %38 = memref.load %arg3[%c1_17, %c0_18] : memref<4x4xf32, #tpu.memory_space<smem>>
    %39 = vector.broadcast %38 : f32 to vector<2x128xf32>
    %40 = arith.mulf %37, %39 : vector<2x128xf32>
    %41 = vector.extract_strided_slice %1 {offsets = [1, 0, 0], sizes = [1, 2, 128], strides = [1, 1, 1]} : vector<4x2x128xf32> to vector<1x2x128xf32>
    %42 = vector.shape_cast %41 : vector<1x2x128xf32> to vector<2x128xf32>
    %c1_19 = arith.constant 1 : index
    %c1_20 = arith.constant 1 : index
    %43 = memref.load %arg3[%c1_19, %c1_20] : memref<4x4xf32, #tpu.memory_space<smem>>
    %44 = vector.broadcast %43 : f32 to vector<2x128xf32>
    %45 = arith.mulf %42, %44 : vector<2x128xf32>
    %46 = arith.addf %40, %45 : vector<2x128xf32>
    %47 = vector.extract_strided_slice %1 {offsets = [2, 0, 0], sizes = [1, 2, 128], strides = [1, 1, 1]} : vector<4x2x128xf32> to vector<1x2x128xf32>
    %48 = vector.shape_cast %47 : vector<1x2x128xf32> to vector<2x128xf32>
    %c1_21 = arith.constant 1 : index
    %c2_22 = arith.constant 2 : index
    %49 = memref.load %arg3[%c1_21, %c2_22] : memref<4x4xf32, #tpu.memory_space<smem>>
    %50 = vector.broadcast %49 : f32 to vector<2x128xf32>
    %51 = arith.mulf %48, %50 : vector<2x128xf32>
    %52 = arith.addf %46, %51 : vector<2x128xf32>
    %53 = vector.extract_strided_slice %1 {offsets = [3, 0, 0], sizes = [1, 2, 128], strides = [1, 1, 1]} : vector<4x2x128xf32> to vector<1x2x128xf32>
    %54 = vector.shape_cast %53 : vector<1x2x128xf32> to vector<2x128xf32>
    %c1_23 = arith.constant 1 : index
    %c3_24 = arith.constant 3 : index
    %55 = memref.load %arg3[%c1_23, %c3_24] : memref<4x4xf32, #tpu.memory_space<smem>>
    %56 = vector.broadcast %55 : f32 to vector<2x128xf32>
    %57 = arith.mulf %54, %56 : vector<2x128xf32>
    %58 = arith.addf %52, %57 : vector<2x128xf32>
    %c1_25 = arith.constant 1 : index
    %59 = memref.load %arg4[%c1_25] : memref<4xf32, #tpu.memory_space<smem>>
    %60 = vector.broadcast %59 : f32 to vector<2x128xf32>
    %61 = arith.addf %58, %60 : vector<2x128xf32>
    %c0_26 = arith.constant 0 : index
    %c1_27 = arith.constant 1 : index
    %c0_28 = arith.constant 0 : index
    %c0_29 = arith.constant 0 : index
    %62 = vector.load %arg5[%c0_26, %c1_27, %c0_28, %c0_29] : memref<1x4x2x128xf32, #tpu.memory_space<vmem>>, vector<1x1x2x128xf32>
    %63 = vector.shape_cast %62 : vector<1x1x2x128xf32> to vector<2x128xf32>
    %64 = vector.shape_cast %61 : vector<2x128xf32> to vector<1x1x2x128xf32>
    tpu.vector_store %arg5[%c0_26, %c1_27, %c0_28, %c0_29], %64 {strides = array<i32>} : memref<1x4x2x128xf32, #tpu.memory_space<vmem>>, vector<1x1x2x128xf32>,
    %cst_30 = arith.constant 0.000000e+00 : f32
    %65 = vector.broadcast %cst_30 : f32 to vector<2x128xf32>
    %66 = arith.maximumf %61, %65 : vector<2x128xf32>
    %c0_31 = arith.constant 0 : index
    %c1_32 = arith.constant 1 : index
    %c0_33 = arith.constant 0 : index
    %c0_34 = arith.constant 0 : index
    %67 = vector.load %arg6[%c0_31, %c1_32, %c0_33, %c0_34] : memref<1x4x2x128xf32, #tpu.memory_space<vmem>>, vector<1x1x2x128xf32>
    %68 = vector.shape_cast %67 : vector<1x1x2x128xf32> to vector<2x128xf32>
    %69 = vector.shape_cast %66 : vector<2x128xf32> to vector<1x1x2x128xf32>
    tpu.vector_store %arg6[%c0_31, %c1_32, %c0_33, %c0_34], %69 {strides = array<i32>} : memref<1x4x2x128xf32, #tpu.memory_space<vmem>>, vector<1x1x2x128xf32>,
    %70 = vector.extract_strided_slice %1 {offsets = [0, 0, 0], sizes = [1, 2, 128], strides = [1, 1, 1]} : vector<4x2x128xf32> to vector<1x2x128xf32>
    %71 = vector.shape_cast %70 : vector<1x2x128xf32> to vector<2x128xf32>
    %c2_35 = arith.constant 2 : index
    %c0_36 = arith.constant 0 : index
    %72 = memref.load %arg3[%c2_35, %c0_36] : memref<4x4xf32, #tpu.memory_space<smem>>
    %73 = vector.broadcast %72 : f32 to vector<2x128xf32>
    %74 = arith.mulf %71, %73 : vector<2x128xf32>
    %75 = vector.extract_strided_slice %1 {offsets = [1, 0, 0], sizes = [1, 2, 128], strides = [1, 1, 1]} : vector<4x2x128xf32> to vector<1x2x128xf32>
    %76 = vector.shape_cast %75 : vector<1x2x128xf32> to vector<2x128xf32>
    %c2_37 = arith.constant 2 : index
    %c1_38 = arith.constant 1 : index
    %77 = memref.load %arg3[%c2_37, %c1_38] : memref<4x4xf32, #tpu.memory_space<smem>>
    %78 = vector.broadcast %77 : f32 to vector<2x128xf32>
    %79 = arith.mulf %76, %78 : vector<2x128xf32>
    %80 = arith.addf %74, %79 : vector<2x128xf32>
    %81 = vector.extract_strided_slice %1 {offsets = [2, 0, 0], sizes = [1, 2, 128], strides = [1, 1, 1]} : vector<4x2x128xf32> to vector<1x2x128xf32>
    %82 = vector.shape_cast %81 : vector<1x2x128xf32> to vector<2x128xf32>
    %c2_39 = arith.constant 2 : index
    %c2_40 = arith.constant 2 : index
    %83 = memref.load %arg3[%c2_39, %c2_40] : memref<4x4xf32, #tpu.memory_space<smem>>
    %84 = vector.broadcast %83 : f32 to vector<2x128xf32>
    %85 = arith.mulf %82, %84 : vector<2x128xf32>
    %86 = arith.addf %80, %85 : vector<2x128xf32>
    %87 = vector.extract_strided_slice %1 {offsets = [3, 0, 0], sizes = [1, 2, 128], strides = [1, 1, 1]} : vector<4x2x128xf32> to vector<1x2x128xf32>
    %88 = vector.shape_cast %87 : vector<1x2x128xf32> to vector<2x128xf32>
    %c2_41 = arith.constant 2 : index
    %c3_42 = arith.constant 3 : index
    %89 = memref.load %arg3[%c2_41, %c3_42] : memref<4x4xf32, #tpu.memory_space<smem>>
    %90 = vector.broadcast %89 : f32 to vector<2x128xf32>
    %91 = arith.mulf %88, %90 : vector<2x128xf32>
    %92 = arith.addf %86, %91 : vector<2x128xf32>
    %c2_43 = arith.constant 2 : index
    %93 = memref.load %arg4[%c2_43] : memref<4xf32, #tpu.memory_space<smem>>
    %94 = vector.broadcast %93 : f32 to vector<2x128xf32>
    %95 = arith.addf %92, %94 : vector<2x128xf32>
    %c0_44 = arith.constant 0 : index
    %c2_45 = arith.constant 2 : index
    %c0_46 = arith.constant 0 : index
    %c0_47 = arith.constant 0 : index
    %96 = vector.load %arg5[%c0_44, %c2_45, %c0_46, %c0_47] : memref<1x4x2x128xf32, #tpu.memory_space<vmem>>, vector<1x1x2x128xf32>
    %97 = vector.shape_cast %96 : vector<1x1x2x128xf32> to vector<2x128xf32>
    %98 = vector.shape_cast %95 : vector<2x128xf32> to vector<1x1x2x128xf32>
    tpu.vector_store %arg5[%c0_44, %c2_45, %c0_46, %c0_47], %98 {strides = array<i32>} : memref<1x4x2x128xf32, #tpu.memory_space<vmem>>, vector<1x1x2x128xf32>,
    %cst_48 = arith.constant 0.000000e+00 : f32
    %99 = vector.broadcast %cst_48 : f32 to vector<2x128xf32>
    %100 = arith.maximumf %95, %99 : vector<2x128xf32>
    %c0_49 = arith.constant 0 : index
    %c2_50 = arith.constant 2 : index
    %c0_51 = arith.constant 0 : index
    %c0_52 = arith.constant 0 : index
    %101 = vector.load %arg6[%c0_49, %c2_50, %c0_51, %c0_52] : memref<1x4x2x128xf32, #tpu.memory_space<vmem>>, vector<1x1x2x128xf32>
    %102 = vector.shape_cast %101 : vector<1x1x2x128xf32> to vector<2x128xf32>
    %103 = vector.shape_cast %100 : vector<2x128xf32> to vector<1x1x2x128xf32>
    tpu.vector_store %arg6[%c0_49, %c2_50, %c0_51, %c0_52], %103 {strides = array<i32>} : memref<1x4x2x128xf32, #tpu.memory_space<vmem>>, vector<1x1x2x128xf32>,
    %104 = vector.extract_strided_slice %1 {offsets = [0, 0, 0], sizes = [1, 2, 128], strides = [1, 1, 1]} : vector<4x2x128xf32> to vector<1x2x128xf32>
    %105 = vector.shape_cast %104 : vector<1x2x128xf32> to vector<2x128xf32>
    %c3_53 = arith.constant 3 : index
    %c0_54 = arith.constant 0 : index
    %106 = memref.load %arg3[%c3_53, %c0_54] : memref<4x4xf32, #tpu.memory_space<smem>>
    %107 = vector.broadcast %106 : f32 to vector<2x128xf32>
    %108 = arith.mulf %105, %107 : vector<2x128xf32>
    %109 = vector.extract_strided_slice %1 {offsets = [1, 0, 0], sizes = [1, 2, 128], strides = [1, 1, 1]} : vector<4x2x128xf32> to vector<1x2x128xf32>
    %110 = vector.shape_cast %109 : vector<1x2x128xf32> to vector<2x128xf32>
    %c3_55 = arith.constant 3 : index
    %c1_56 = arith.constant 1 : index
    %111 = memref.load %arg3[%c3_55, %c1_56] : memref<4x4xf32, #tpu.memory_space<smem>>
    %112 = vector.broadcast %111 : f32 to vector<2x128xf32>
    %113 = arith.mulf %110, %112 : vector<2x128xf32>
    %114 = arith.addf %108, %113 : vector<2x128xf32>
    %115 = vector.extract_strided_slice %1 {offsets = [2, 0, 0], sizes = [1, 2, 128], strides = [1, 1, 1]} : vector<4x2x128xf32> to vector<1x2x128xf32>
    %116 = vector.shape_cast %115 : vector<1x2x128xf32> to vector<2x128xf32>
    %c3_57 = arith.constant 3 : index
    %c2_58 = arith.constant 2 : index
    %117 = memref.load %arg3[%c3_57, %c2_58] : memref<4x4xf32, #tpu.memory_space<smem>>
    %118 = vector.broadcast %117 : f32 to vector<2x128xf32>
    %119 = arith.mulf %116, %118 : vector<2x128xf32>
    %120 = arith.addf %114, %119 : vector<2x128xf32>
    %121 = vector.extract_strided_slice %1 {offsets = [3, 0, 0], sizes = [1, 2, 128], strides = [1, 1, 1]} : vector<4x2x128xf32> to vector<1x2x128xf32>
    %122 = vector.shape_cast %121 : vector<1x2x128xf32> to vector<2x128xf32>
    %c3_59 = arith.constant 3 : index
    %c3_60 = arith.constant 3 : index
    %123 = memref.load %arg3[%c3_59, %c3_60] : memref<4x4xf32, #tpu.memory_space<smem>>
    %124 = vector.broadcast %123 : f32 to vector<2x128xf32>
    %125 = arith.mulf %122, %124 : vector<2x128xf32>
    %126 = arith.addf %120, %125 : vector<2x128xf32>
    %c3_61 = arith.constant 3 : index
    %127 = memref.load %arg4[%c3_61] : memref<4xf32, #tpu.memory_space<smem>>
    %128 = vector.broadcast %127 : f32 to vector<2x128xf32>
    %129 = arith.addf %126, %128 : vector<2x128xf32>
    %c0_62 = arith.constant 0 : index
    %c3_63 = arith.constant 3 : index
    %c0_64 = arith.constant 0 : index
    %c0_65 = arith.constant 0 : index
    %130 = vector.load %arg5[%c0_62, %c3_63, %c0_64, %c0_65] : memref<1x4x2x128xf32, #tpu.memory_space<vmem>>, vector<1x1x2x128xf32>
    %131 = vector.shape_cast %130 : vector<1x1x2x128xf32> to vector<2x128xf32>
    %132 = vector.shape_cast %129 : vector<2x128xf32> to vector<1x1x2x128xf32>
    tpu.vector_store %arg5[%c0_62, %c3_63, %c0_64, %c0_65], %132 {strides = array<i32>} : memref<1x4x2x128xf32, #tpu.memory_space<vmem>>, vector<1x1x2x128xf32>,
    %cst_66 = arith.constant 0.000000e+00 : f32
    %133 = vector.broadcast %cst_66 : f32 to vector<2x128xf32>
    %134 = arith.maximumf %129, %133 : vector<2x128xf32>
    %c0_67 = arith.constant 0 : index
    %c3_68 = arith.constant 3 : index
    %c0_69 = arith.constant 0 : index
    %c0_70 = arith.constant 0 : index
    %135 = vector.load %arg6[%c0_67, %c3_68, %c0_69, %c0_70] : memref<1x4x2x128xf32, #tpu.memory_space<vmem>>, vector<1x1x2x128xf32>
    %136 = vector.shape_cast %135 : vector<1x1x2x128xf32> to vector<2x128xf32>
    %137 = vector.shape_cast %134 : vector<2x128xf32> to vector<1x1x2x128xf32>
    tpu.vector_store %arg6[%c0_67, %c3_68, %c0_69, %c0_70], %137 {strides = array<i32>} : memref<1x4x2x128xf32, #tpu.memory_space<vmem>>, vector<1x1x2x128xf32>,
    return
  }
  func.func @transform_0(%arg0: i32, %arg1: i32) -> (i32, i32, i32, i32) {
    %c0_i32 = arith.constant 0 : i32
    %c0_i32_0 = arith.constant 0 : i32
    %c0_i32_1 = arith.constant 0 : i32
    return %arg0, %c0_i32, %arg1, %c0_i32_0 : i32, i32, i32, i32
  }
  func.func @transform_1(%arg0: i32, %arg1: i32) -> (i32, i32) {
    %c0_i32 = arith.constant 0 : i32
    %c0_i32_0 = arith.constant 0 : i32
    %c0_i32_1 = arith.constant 0 : i32
    return %c0_i32, %c0_i32_0 : i32, i32
  }
  func.func @transform_2(%arg0: i32, %arg1: i32) -> i32 {
    %c0_i32 = arith.constant 0 : i32
    %c0_i32_0 = arith.constant 0 : i32
    return %c0_i32 : i32
  }
  func.func @transform_3(%arg0: i32, %arg1: i32) -> (i32, i32, i32, i32) {
    %c0_i32 = arith.constant 0 : i32
    %c0_i32_0 = arith.constant 0 : i32
    %c0_i32_1 = arith.constant 0 : i32
    return %arg0, %c0_i32, %arg1, %c0_i32_0 : i32, i32, i32, i32
  }
  func.func @transform_4(%arg0: i32, %arg1: i32) -> (i32, i32, i32, i32) {
    %c0_i32 = arith.constant 0 : i32
    %c0_i32_0 = arith.constant 0 : i32
    %c0_i32_1 = arith.constant 0 : i32
    return %arg0, %c0_i32, %arg1, %c0_i32_0 : i32, i32, i32, i32
  }
}

</mosaic_0001>

<bundles_post_ra>
// kernel: tpu_custom_call.1
= control target key start
LH: loop header
LB: loop body
LE: loop exit
PB: predicated region body
PF: predicated region fallthrough
CT: control target
= control target key end

     0   :  { %s1147_s0 = inlined_call_operand.hbm [shape: f32[2,4,2,128], index: 0, kind: input, shape index: {}]   ;;  %s1148_s1 = inlined_call_operand.hbm [shape: f32[4,4], index: 1, kind: input, shape index: {}]   ;;  %s1149_s2 = inlined_call_operand.vmem [shape: f32[4], index: 2, kind: input, shape index: {}]   ;;  %s1150_s3 = inlined_call_operand.hbm [shape: f32[2,4,2,128], index: 3, kind: output, shape index: {0}]   ;;  %s1151_s4 = inlined_call_operand.hbm [shape: f32[2,4,2,128], index: 4, kind: output, shape index: {1}]  }
   0x1   :  { %1152 = sst [smem:[#allocation17_spill]] %s1148_s1 }
   0x2   :  { %1153 = sst [smem:[#allocation18_spill]] %s1149_s2 }
   0x3   :  { %10 = vsyncpa [#allocation3], 0 }
   0x4   :  { %12 = vsyncpa [#allocation3 + $0x1], 0 }
   0x5   :  { %13 = vsyncpa [#allocation5], 0 }
   0x6   :  { %14 = vsyncpa [#allocation6], 0 }
   0x7   :  { %15 = vsyncpa [#allocation4], 0 }
   0x8   :  { %17 = vsyncpa [#allocation4 + $0x1], 0 }
   0x9   :  { %18 = vsyncpa [#allocation11], 0 }
   0xa   :  { %20 = vsyncpa [#allocation11 + $0x1], 0  ;;  %s910_s15 = smov 0   ;;  %s912_s16 = smov 0  }
   0xb   :  { %s914_s17 = smov 0   ;;  %s916_s18 = smov 0  }
   0xc   :  { %s918_s19 = smov 0   ;;  %s920_s20 = smov 0  }
   0xd LB: > { %s553_s21 = sadd.s32 4294967295, %s877_s20   ;;  %s554_s22 = sadd.s32 4294967294, %s877_s20   ;;  %s877_s20 = sphi %s920_s20, %s26_s20   ;;  %s873_s19 = sphi %s918_s19, %s1167_s19   ;;  %s869_s18 = sphi %s916_s18, %s1166_s18   ;;  %s865_s17 = sphi %s914_s17, %s1165_s17   ;;  %s861_s16 = sphi %s912_s16, %s1164_s16   ;;  %s857_s15 = sphi %s910_s15, %s1163_s15  }
   0xe   : > { %s47_s23 = sadd.s32 1, %s865_s17  ;;  %p54_p0 = scmp.ne.s32.totalorder %s865_s17, %s861_s16 }
   0xf   : > { %p55_p1 = scmp.eq.s32.totalorder %s877_s20, 0  ;;  %p60_p2 = scmp.ne.s32.totalorder %s861_s16, %s857_s15 }
  0x10   : > { %p948_p3 = scmp.eq.s32.totalorder %s553_s21, 0  ;;  %p128_p4 = scmp.eq.s32.totalorder %s553_s21, 1 }
  0x11   : > { %p952_p5 = por %p55_p1, %p54_p0  ;;  %p134_p6 = scmp.eq.s32.totalorder %s554_s22, 1 }
  0x12   : > { %p958_p7 = por %p948_p3, %p60_p2  ;;  %p962_p8 = por %p128_p4, %p54_p0 }
  0x13   : > { %p966_p9 = por %p134_p6, %p60_p2  ;;  %p555_p10 = scmp.ge.s32.totalorder %s877_s20, 1 }
  0x14   : > { %p169_p11 = scmp.lt.s32.totalorder %s877_s20, 3  ;;  %s1159_s1 = sld [smem:[#allocation17_spill]] }
  0x15   : > { %p558_p13 = scmp.ge.s32.totalorder %s877_s20, 2  ;;  %p637_p0 = scmp.lt.s32.totalorder %s877_s20, 2 }
  0x16   : > { %p975_p12 = pnand %p555_p10, %p169_p11  ;;  %s1161_s2 = sld [smem:[#allocation18_spill]] }
  0x17   : > { %p988_p2 = pnand %p637_p0, %p952_p5  ;;  %s879_s11 = smov [#allocation7]  }
  0x18   : > { %p617_p1 = pneg %p975_p12  ;;  %s880_s12 = smov [#allocation8]  }
  0x19   : > { %s38_s13 = sadd.s32 1, %s873_s19  ;;  %s202_s14 = sand.u32 1, %s865_s17  }
  0x1a   : > { %s181_s5 = sshll.u32 %s1159_s1, 4  ;;  %p618_p4 = pnand %p617_p1, %p948_p3  ;;  %s182_s5 = int_to_ptr.hbm [resolvable:$true] %s181_s5 }
  0x1b   : > { %p40_p6 = scmp.ge.s32.totalorder %s38_s13, 2  ;;  %s559_s21 = sshll.u32 %s202_s14, 3 }
  0x1c   : > { %s191_s9 = sshll.u32 %s1161_s2, 4  ;;  %s600_s22 = sshll.u32 %s873_s19, 3  ;;  %s192_s9 = int_to_ptr.vmem [resolvable:$true] %s191_s9 }
  0x1d   : > { %620 = dma.hbm_to_smem (!%p618_p4), %s182_s5, 64, %s879_s11, [#allocation5]  }
  0x1e   : > { %623 = dma.vmem_to_smem (!%p618_p4), %s192_s9, 16, %s880_s12, [#allocation6]  }
  0x1f   : > { %s1169_s13 = smov (%p40_p6, %s38_s13), 0  ;;  %s212_s30 = scalar_lea.hbm %s1147_s0, %s600_s22 }
  0x20   : > { %s42_s7 = ssub.s32 %s873_s19, %s1169_s13  ;;  %s213_s8 = sshll.u32 %s212_s30, 4  ;;  %s214_s8 = int_to_ptr.hbm [resolvable:$true] %s213_s8 }
  0x21   : > { %p45_p5 = scmp.eq.s32.totalorder %s42_s7, 0  ;;  %s206_s5 = scalar_lea.vmem [#allocation2], %s559_s21 }
  0x22   : > { %s215_s11 = sshll.u32 %s206_s5, 4  ;;  %s203_s12 = scalar_lea.sflag [#allocation3], %s202_s14  ;;  %s216_s11 = int_to_ptr.vmem [resolvable:$true] %s215_s11 }
  0x23   : > { %s1007_s9 = scalar_select %p45_p5, %s865_s17, %s47_s23  }
  0x24   : > { %s881_s1 = smov 32   ;;  %s882_s2 = smov 2  }
  0x25   : > { %627 = dma.hbm_to_vmem [thread:$0]  (!%p988_p2), %s214_s8, 128, %s216_s11, %s203_s12, %s881_s1, %s881_s1, %s882_s2  }
  0x26   : > { %227 = sbr.rel (%p975_p12) target bundleno = 99 (0x63), region = 32  ;;  %s1014_s22 = sand.u32 (!%p975_p12), 1, %s861_s16  }
  0x27   : > { %s1017_s21 = sshll.u32 (!%p975_p12), %s1014_s22, 3  ;;  %s230_s23 = scalar_lea.sflag (!%p975_p12), [#allocation3], %s1014_s22 }
  0x28   : > { %s233_s25 = scalar_lea.vmem (!%p975_p12), [#allocation2], %s1017_s21 }
  0x2b   : > { %836 = dma.done.wait (%p958_p7), %s230_s23, 128  }
  0x2c   : > { %838 = vsyncadd (%p958_p7), %s230_s23, 4294967168 }
  0x2d   : > { %840 = dma.done.wait (%p948_p3), [#allocation5], 64  }
  0x2e   : > { %842 = vsyncadd (%p948_p3), [#allocation5], 4294967232 }
  0x2f   : > { %844 = dma.done.wait (%p948_p3), [#allocation6], 16  }
  0x30   : > { %846 = vsyncadd (%p948_p3), [#allocation6], 4294967280 }
  0x31   : > { %249 = sfence }
  0x32   : > { %s279_s1 = sld [smem:[#allocation7]]  ;;  %v1033_v0 = vld [vmem:[%s233_s25] sm:$0x3]  ;;  %v1037_v1 = vld [vmem:[%s233_s25 + $0x2] sm:$0x3] }
  0x33   : > { %s568_s2 = sld [smem:[#allocation7 + $0x1]]  ;;  %v1039_v2 = vld [vmem:[%s233_s25 + $0x4] sm:$0x3]  ;;  %v1041_v4 = vld [vmem:[%s233_s25 + $0x6] sm:$0x3] }
  0x34   : > { %s569_s6 = sld [smem:[#allocation7 + $0x2]] }
  0x35   : > { %s570_s10 = sld [smem:[#allocation7 + $0x3]] }
  0x36   : > { %s1035_s26 = sld [smem:[#allocation8]] }
  0x37   : > { %s571_s14 = sld [smem:[#allocation7 + $0x80]] }
  0x38   : > { %v280_v3 = vstv %s279_s1  ;;  %s572_s29 = sld [smem:[#allocation7 + $0x81]] }
  0x39   : > { %v281_v5 = vmul.f32 %v280_v3, %v1033_v0  ;;  %v283_v6 = vstv %s568_s2  ;;  %s573_s24 = sld [smem:[#allocation7 + $0x82]] }
  0x3a   : > { %v284_v7 = vmul.f32 %v283_v6, %v1037_v1  ;;  %v287_v8 = vstv %s569_s6  ;;  %s574_s30 = sld [smem:[#allocation7 + $0x83]]  ;;  %s1058_s6 = scalar_lea.vmem [#allocation9], %s1017_s21 }
  0x3b   : > { %v288_v9 = vmul.f32 %v287_v8, %v1039_v2  ;;  %v291_v10 = vstv %s570_s10  ;;  %s1046_s7 = sld [smem:[#allocation8 + $0x1]] }
  0x3c   : > { %v285_v11 = vadd.f32 %v284_v7, %v281_v5  ;;  %v292_v12 = vmul.f32 %v291_v10, %v1041_v4  ;;  %s578_s8 = sld [smem:[#allocation7 + $0x100]]  ;;  %v295_v17 = vstv %s1035_s26  ;;  %s1065_s26 = scalar_lea.vmem [#allocation10], %s1017_s21 }
  0x3d   : > { %v301_v13 = vstv %s571_s14  ;;  %s579_s5 = sld [smem:[#allocation7 + $0x101]] }
  0x3e   : > { %v289_v14 = vadd.f32 %v288_v9, %v285_v11  ;;  %v302_v15 = vmul.f32 %v301_v13, %v1033_v0  ;;  %v304_v16 = vstv %s572_s29  ;;  %s580_s11 = sld [smem:[#allocation7 + $0x102]]  ;;  %s601_s29 = sshll.u32 %s869_s18, 3 }
  0x3f   : > { %v305_v18 = vmul.f32 %v304_v16, %v1037_v1  ;;  %v308_v19 = vstv %s573_s24  ;;  %s581_s12 = sld [smem:[#allocation7 + $0x103]]  ;;  %s387_s18 = scalar_lea.hbm %s1150_s3, %s601_s29 }
  0x40   : > { %v293_v20 = vadd.f32 %v292_v12, %v289_v14  ;;  %v309_v21 = vmul.f32 %v308_v19, %v1039_v2  ;;  %v312_v22 = vstv %s574_s30  ;;  %s1053_s23 = sld [smem:[#allocation8 + $0x2]]  ;;  %s388_s30 = sshll.u32 %s1058_s6, 4  ;;  %s1086_s30 = int_to_ptr.vmem [resolvable:$true] %s388_s30 }
  0x41   : > { %v306_v23 = vadd.f32 %v305_v18, %v302_v15  ;;  %v313_v24 = vmul.f32 %v312_v22, %v1041_v4  ;;  %s585_s25 = sld [smem:[#allocation7 + $0x180]]  ;;  %v316_v31 = vstv %s1046_s7  ;;  %s390_s7 = sshll.u32 %s387_s18, 4  ;;  %s391_s7 = int_to_ptr.hbm [resolvable:$true] %s390_s7 }
  0x42   : > { %v296_v25 = vadd.f32 %v295_v17, %v293_v20  ;;  %v324_v26 = vstv %s578_s8  ;;  %s586_s1 = sld [smem:[#allocation7 + $0x181]] }
  0x43   : > { %v310_v27 = vadd.f32 %v309_v21, %v306_v23  ;;  %v325_v28 = vmul.f32 %v324_v26, %v1033_v0  ;;  %v327_v29 = vstv %s579_s5  ;;  %s587_s2 = sld [smem:[#allocation7 + $0x182]] }
  0x44   : > { %297 = vst [vmem:[%s1058_s6] sm:$0x3] %v296_v25  ;;  %v298_v30 = vmax.f32 %v296_v25, 0.0  ;;  %v328_v32 = vmul.f32 %v327_v29, %v1037_v1  ;;  %v331_v33 = vstv %s580_s11  ;;  %s588_s10 = sld [smem:[#allocation7 + $0x183]]  ;;  %s405_s11 = scalar_lea.hbm %s1151_s4, %s601_s29 }
  0x45   : > { %v314_v34 = vadd.f32 %v313_v24, %v310_v27  ;;  %v332_v35 = vmul.f32 %v331_v33, %v1039_v2  ;;  %v335_v36 = vstv %s581_s12  ;;  %s1069_s14 = sld [smem:[#allocation8 + $0x3]]  ;;  %s406_s12 = sshll.u32 %s1065_s26, 4  ;;  %s1092_s12 = int_to_ptr.vmem [resolvable:$true] %s406_s12 }
  0x46   : > { %299 = vst [vmem:[%s1065_s26] sm:$0x3] %v298_v30  ;;  %v329_v37 = vadd.f32 %v328_v32, %v325_v28  ;;  %v336_v38 = vmul.f32 %v335_v36, %v1041_v4  ;;  %v339_v45 = vstv %s1053_s23  ;;  %s408_s23 = sshll.u32 %s405_s11, 4  ;;  %s775_s29 = scalar_lea.hbm %s1150_s3, 16  ;;  %s1095_s23 = int_to_ptr.hbm [resolvable:$true] %s408_s23 }
  0x47   : > { %v317_v39 = vadd.f32 %v316_v31, %v314_v34  ;;  %v347_v40 = vstv %s585_s25  ;;  %s370_s25 = scalar_lea.sflag [#allocation4], %s1014_s22 }
  0x48   : > { %v333_v41 = vadd.f32 %v332_v35, %v329_v37  ;;  %v348_v42 = vmul.f32 %v347_v40, %v1033_v0  ;;  %v350_v43 = vstv %s586_s1  ;;  %s769_s1 = sshra.s32 %s391_s7, 4  ;;  %s770_s1 = int_to_ptr.hbm [resolvable:$true] %s769_s1 }
  0x49   : > { %576 = vst [vmem:[%s1058_s6 + $0x2] sm:$0x3] %v317_v39  ;;  %v320_v44 = vmax.f32 %v317_v39, 0.0  ;;  %v351_v46 = vmul.f32 %v350_v43, %v1037_v1  ;;  %v354_v47 = vstv %s587_s2  ;;  %s771_s2 = scalar_lea.hbm %s770_s1, 8  ;;  %p776_p11 = scmp.lt.s32.totalorder %s770_s1, %s1150_s3 }
  0x4a   : > { %v337_v48 = vadd.f32 %v336_v38, %v333_v41  ;;  %v355_v49 = vmul.f32 %v354_v47, %v1039_v2  ;;  %v358_v50 = vstv %s588_s10  ;;  %p772_p3 = scmp.ne.s32.totalorder %s770_s1, %s771_s2  ;;  %p777_p12 = scmp.lt.s32.totalorder %s775_s29, %s771_s2 }
  0x4b   : > { %577 = vst [vmem:[%s1065_s26 + $0x2] sm:$0x3] %v320_v44  ;;  %v352_v51 = vadd.f32 %v351_v46, %v348_v42  ;;  %v359_v52 = vmul.f32 %v358_v50, %v1041_v4  ;;  %v362_v56 = vstv %s1069_s14 }
  0x4c   : > { %v340_v53 = vadd.f32 %v339_v45, %v337_v48  ;;  %p773_p7 = pnand %p772_p3, %p962_p8  ;;  %p778_p0 = por %p777_p12, %p776_p11 }
  0x4d   : > { %v356_v54 = vadd.f32 %v355_v49, %v352_v51 }
  0x4e   : > { %583 = vst [vmem:[%s1058_s6 + $0x4] sm:$0x3] %v340_v53  ;;  %v343_v55 = vmax.f32 %v340_v53, 0.0  ;;  %p774_p10 = pneg %p773_p7 }
  0x4f   : > { %v360_v57 = vadd.f32 %v359_v52, %v356_v54 }
  0x50   : > { %584 = vst [vmem:[%s1065_s26 + $0x4] sm:$0x3] %v343_v55  ;;  %p779_p1 = pnand %p778_p0, %p774_p10 }
  0x51   : > { %v363_v58 = vadd.f32 %v362_v56, %v360_v57 }
  0x53   : > { %590 = vst [vmem:[%s1058_s6 + $0x6] sm:$0x3] %v363_v58  ;;  %v366_v59 = vmax.f32 %v363_v58, 0.0 }
  0x54   : > { %782 = shalt.err (!%p779_p1)
}
  0x55   : > { %s883_s6 = smov 32   ;;  %s884_s18 = smov 2   ;;  %591 = vst [vmem:[%s1065_s26 + $0x6] sm:$0x3] %v366_v59 }
  0x56   : > { %613 = dma.vmem_to_hbm [thread:$0]  (%p962_p8), %s1086_s30, 128, %s391_s7, %s370_s25, %s883_s6, %s883_s6, %s884_s18  }
  0x57   : > { %s375_s8 = scalar_lea.sflag [#allocation11], %s1014_s22  ;;  %s797_s5 = sshra.s32 %s1095_s23, 4  ;;  %s798_s5 = int_to_ptr.hbm [resolvable:$true] %s797_s5 }
  0x58   : > { %s799_s11 = scalar_lea.hbm %s798_s5, 8  ;;  %s803_s10 = scalar_lea.hbm %s1151_s4, 16 }
  0x59   : > { %p800_p2 = scmp.ne.s32.totalorder %s798_s5, %s799_s11  ;;  %p804_p5 = scmp.lt.s32.totalorder %s798_s5, %s1151_s4 }
  0x5a   : > { %p805_p3 = scmp.lt.s32.totalorder %s803_s10, %s799_s11 }
  0x5b   : > { %p801_p4 = pnand %p800_p2, %p962_p8 }
  0x5c   : > { %p806_p7 = por %p805_p3, %p804_p5 }
  0x5d   : > { %p802_p6 = pneg %p801_p4 }
  0x5f   : > { %p807_p10 = pnand %p806_p7, %p802_p6 }
  0x61   : > { %810 = shalt.err (!%p807_p10)
}
  0x62   : > { %614 = dma.vmem_to_hbm [thread:$0]  (%p962_p8), %s1092_s12, 128, %s1095_s23, %s375_s8, %s883_s6, %s883_s6, %s884_s18  }
  0x63 PF: > { %s423_s22 = sand.u32 1, %s857_s15   ;;  %p629_p11 = pnand %p558_p13, %p966_p9 }
  0x64   : > { %s424_s26 = scalar_lea.sflag [#allocation4], %s423_s22 }
  0x65   : > { %p630_p12 = pneg %p629_p11 }
  0x67   : > { %848 = dma.done.wait (%p630_p12), %s424_s26, 128  }
  0x68   : > { %850 = vsyncadd (%p630_p12), %s424_s26, 4294967168  ;;  %s434_s30 = scalar_lea.sflag [#allocation11], %s423_s22 }
  0x69   : > { %852 = dma.done.wait (%p630_p12), %s434_s30, 128  }
  0x6a   : > { %854 = vsyncadd (%p630_p12), %s434_s30, 4294967168  ;;  %s26_s20 = sadd.s32 1, %s877_s20   ;;  %s1163_s15 = smov %s861_s16 }
  0x6b   : > { %p23_p0 = scmp.ge.s32.totalorder %s26_s20, 4   ;;  %s1164_s16 = smov %s865_s17 }
  0x6c   : > { %s1165_s17 = smov %s1007_s9  ;;  %s1166_s18 = smov %s873_s19 }
  0x6d   : > { %s1167_s19 = smov %s1169_s13  ;;  %25 = sbr.rel (!%p23_p0) target bundleno = 13 (0xd), region = 110 }
  0x72   :  { %440 = vsyncpa [#allocation3], 1 }
  0x73   :  { %442 = vsyncpa [#allocation3 + $0x1], 1 }
  0x74   :  { %443 = vsyncpa [#allocation4], 1 }
  0x75   :  { %445 = vsyncpa [#allocation4 + $0x1], 1 }
  0x76   :  { %446 = vsyncpa [#allocation11], 1 }
  0x77   :  { %448 = vsyncpa [#allocation11 + $0x1], 1 }
  0x78   :  { %449 = vsyncpa [#allocation5], 1 }
  0x79   :  { %451 = vsyncpa [#allocation5 + $0x1], 1 }
  0x7a   :  { %452 = vsyncpa [#allocation6], 1 }
  0x7b   :  { %454 = vsyncpa [#allocation6 + $0x1], 1 }

</bundles_post_ra>
